<compile_context>
chip_gen: v5e
topology: v5e:2x2
jax: 0.10.0
libtpu: 0.0.40
codegen_flags: <defaults>
</compile_context>

<pallas_src>
import functools
import math

import jax
import jax.numpy as jnp
from jax import lax
from jax.experimental import pallas as pl
from jax.experimental.pallas import tpu as pltpu


# --------------------------------------------------------------------------
# Tile-size helper: largest tile <= target (halving) that divides dim, else
# fall back to the full dim (which always satisfies the (8,128) block rule).
# --------------------------------------------------------------------------
def _pick_tile(dim, target, floor):
    t = target
    while t >= floor:
        if dim >= t and dim % t == 0:
            return t
        t //= 2
    return dim


# --------------------------------------------------------------------------
# Kernel 1: tiled dense layer  y = x @ W + b  with a K-reduction grid axis.
# --------------------------------------------------------------------------
def _linear_kernel(x_ref, w_ref, b_ref, o_ref, acc_ref):
    @pl.when(pl.program_id(2) == 0)
    def _init():
        acc_ref[...] = jnp.zeros_like(acc_ref)

    acc_ref[...] += jnp.dot(x_ref[...], w_ref[...],
                            preferred_element_type=jnp.float32)

    @pl.when(pl.program_id(2) == pl.num_programs(2) - 1)
    def _finalize():  # bias added once, in the epilogue only
        o_ref[...] = (acc_ref[...] + b_ref[...].astype(jnp.float32)).astype(o_ref.dtype)


def linear(x, w, b, *, tm=256, tn=512, tk=512):
    """x: (M, K), w: (K, N), b: (1, N) -> (M, N), tiled + pipelined."""
    M, K = x.shape
    N = w.shape[1]
    tm = _pick_tile(M, tm, 8)
    tn = _pick_tile(N, tn, 128)
    tk = _pick_tile(K, tk, 128)
    grid = (M // tm, N // tn, K // tk)
    return pl.pallas_call(
        _linear_kernel,
        out_shape=jax.ShapeDtypeStruct((M, N), x.dtype),
        grid=grid,
        in_specs=[
            pl.BlockSpec((tm, tk), lambda i, j, k: (i, k)),
            pl.BlockSpec((tk, tn), lambda i, j, k: (k, j)),
            pl.BlockSpec((1, tn), lambda i, j, k: (0, j)),
        ],
        out_specs=pl.BlockSpec((tm, tn), lambda i, j, k: (i, j)),
        scratch_shapes=[pltpu.VMEM((tm, tn), jnp.float32)],
        compiler_params=pltpu.CompilerParams(
            dimension_semantics=("parallel", "parallel", "arbitrary")),
        cost_estimate=pl.CostEstimate(
            flops=2 * M * N * K,
            transcendentals=0,
            bytes_accessed=4 * (M * K + K * N + M * N + N)),
    )(x, w, b)


# --------------------------------------------------------------------------
# Kernel 2: flash-style scaled dot-product attention over all heads.
# Inputs are (B, S, G, H, d_k) views of the lane-dense projections, where G is
# either 3 (fused QKV slab: q=0, k=1, v=2) or 1 (separate projections). Output
# is a contiguous (B, Sq, H, d_k) slab, i.e. lane-dense (B, Sq, H*d_k).
# --------------------------------------------------------------------------
def _flash_attn_kernel(q_ref, k_ref, v_ref, o_ref, m_ref, l_ref, acc_ref, *, scale):
    # q_ref: (1, tq, 1, H, Dk); k_ref/v_ref: (1, tkv, 1, H, Dk); o_ref: (1, tq, H, Dk)
    n_heads = q_ref.shape[3]
    ki = pl.program_id(2)

    @pl.when(ki == 0)
    def _init():
        m_ref[...] = jnp.full_like(m_ref, -jnp.inf)
        l_ref[...] = jnp.zeros_like(l_ref)
        acc_ref[...] = jnp.zeros_like(acc_ref)

    for h in range(n_heads):  # static unroll; each head is a 2-D MXU dot
        q = q_ref[0, :, 0, h, :].astype(jnp.float32) * scale   # scale folded into Q
        k = k_ref[0, :, 0, h, :].astype(jnp.float32)
        v = v_ref[0, :, 0, h, :].astype(jnp.float32)

        # scores = q @ k^T : contract d_k directly, no explicit transpose of K.
        s = lax.dot_general(q, k, (((1,), (1,)), ((), ())),
                            preferred_element_type=jnp.float32)   # (tq, tkv)

        m_prev = m_ref[h]                                          # (tq, 1)
        m_new = jnp.maximum(m_prev, jnp.max(s, axis=-1, keepdims=True))
        alpha = jnp.exp(m_prev - m_new)
        p = jnp.exp(s - m_new)                                     # (tq, tkv)

        l_ref[h] = alpha * l_ref[h] + jnp.sum(p, axis=-1, keepdims=True)
        acc_ref[h] = alpha * acc_ref[h] + jnp.dot(
            p, v, preferred_element_type=jnp.float32)
        m_ref[h] = m_new

    @pl.when(ki == pl.num_programs(2) - 1)
    def _finalize():
        for h in range(n_heads):
            inv_l = pl.reciprocal(l_ref[h], approx=True)           # EUP, not VALU
            o_ref[0, :, h, :] = (acc_ref[h] * inv_l).astype(o_ref.dtype)


def flash_attention(q, k, v, *, q_slab=0, k_slab=0, v_slab=0, tq=128, tkv=128):
    """softmax(q k^T / sqrt(d_k)) v over (B, S, G, H, d_k) head views.

    `*_slab` selects the slice along axis G (3 for fused QKV where q/k/v are the
    same array; 1 for separate projections)."""
    B, Sq, _, H, Dk = q.shape
    Sk = k.shape[1]
    tq = _pick_tile(Sq, tq, 8)
    tkv = _pick_tile(Sk, tkv, 8)
    grid = (B, Sq // tq, Sk // tkv)
    scale = 1.0 / math.sqrt(Dk)

    def q_map(slab):
        return lambda b, qi, ki: (b, qi, slab, 0, 0)

    def kv_map(slab):
        return lambda b, qi, ki: (b, ki, slab, 0, 0)

    return pl.pallas_call(
        functools.partial(_flash_attn_kernel, scale=scale),
        out_shape=jax.ShapeDtypeStruct((B, Sq, H, Dk), q.dtype),
        grid=grid,
        in_specs=[
            pl.BlockSpec((1, tq, 1, H, Dk), q_map(q_slab)),
            pl.BlockSpec((1, tkv, 1, H, Dk), kv_map(k_slab)),
            pl.BlockSpec((1, tkv, 1, H, Dk), kv_map(v_slab)),
        ],
        out_specs=pl.BlockSpec((1, tq, H, Dk), lambda b, qi, ki: (b, qi, 0, 0)),
        scratch_shapes=[
            pltpu.VMEM((H, tq, 1), jnp.float32),    # running max  m_i
            pltpu.VMEM((H, tq, 1), jnp.float32),    # running sum  l_i
            pltpu.VMEM((H, tq, Dk), jnp.float32),   # output accumulator
        ],
        compiler_params=pltpu.CompilerParams(
            dimension_semantics=("parallel", "parallel", "arbitrary")),
        cost_estimate=pl.CostEstimate(
            flops=4 * B * H * Sq * Sk * Dk,
            transcendentals=B * H * Sq * Sk,
            bytes_accessed=4 * (2 * B * Sq * H * Dk + 2 * B * Sk * H * Dk)),
    )(q, k, v)


# --------------------------------------------------------------------------
# Module wrapper (parameter init + glue; all heavy math in the two kernels)
# --------------------------------------------------------------------------
class MultiHeadAttentionPallas:
    def __init__(self, d_model: int, n_heads: int, key,
                 lin_tiles=(256, 512, 512), attn_tiles=(128, 128)):
        assert d_model % n_heads == 0, "d_model must be divisible by n_heads"
        self.d_model = d_model
        self.n_heads = n_heads
        self.d_k = d_model // n_heads
        self.lin_tiles = lin_tiles
        self.attn_tiles = attn_tiles

        keys = jax.random.split(key, 8)
        bound = 1.0 / math.sqrt(d_model)  # matches nn.Linear default init range

        def init_w(k):
            return jax.random.uniform(k, (d_model, d_model), jnp.float32, -bound, bound)

        def init_b(k):
            return jax.random.uniform(k, (1, d_model), jnp.float32, -bound, bound)

        self.w_q, self.w_k, self.w_v, self.w_o = (init_w(keys[i]) for i in range(4))
        self.b_q, self.b_k, self.b_v, self.b_o = (init_b(keys[i]) for i in range(4, 8))
        # Fused QKV weights: self-attention reads the activations from HBM once.
        self.w_qkv = jnp.concatenate([self.w_q, self.w_k, self.w_v], axis=1)
        self.b_qkv = jnp.concatenate([self.b_q, self.b_k, self.b_v], axis=1)

    def __call__(self, Q, K, V, mask=None):
        if mask is not None:
            # TODO(synk): optional attention mask not implemented (needs a masked
            # score add inside the flash kernel before the running max / exp).
            raise NotImplementedError("mask is not supported by the Pallas kernels")

        B, Sq, D = Q.shape
        Sk = K.shape[1]
        H, Dk = self.n_heads, self.d_k
        tm, tn, tk = self.lin_tiles
        tq, tkv = self.attn_tiles

        if Q is K and K is V:
            # Self-attention: single fused QKV matmul; flash kernel reads the three
            # slabs of the (B, S, 3, H, Dk) view directly -- no jnp.split copies.
            qkv = linear(Q.reshape(B * Sq, D), self.w_qkv, self.b_qkv,
                         tm=tm, tn=tn, tk=tk)
            qkv = qkv.reshape(B, Sq, 3, H, Dk)           # free view
            attn = flash_attention(qkv, qkv, qkv, q_slab=0, k_slab=1, v_slab=2,
                                   tq=tq, tkv=tkv)
        else:
            q = linear(Q.reshape(B * Sq, D), self.w_q, self.b_q,
                       tm=tm, tn=tn, tk=tk).reshape(B, Sq, 1, H, Dk)
            k = linear(K.reshape(B * Sk, D), self.w_k, self.b_k,
                       tm=tm, tn=tn, tk=tk).reshape(B, Sk, 1, H, Dk)
            v = linear(V.reshape(B * Sk, D), self.w_v, self.b_v,
                       tm=tm, tn=tn, tk=tk).reshape(B, Sk, 1, H, Dk)
            attn = flash_attention(q, k, v, q_slab=0, k_slab=0, v_slab=0,
                                   tq=tq, tkv=tkv)

        # Head "combine" is a free reshape of the contiguous (B, Sq, H, Dk) slab.
        out = linear(attn.reshape(B * Sq, D), self.w_o, self.b_o, tm=tm, tn=tn, tk=tk)
        return out.reshape(B, Sq, D)


# --------------------------------------------------------------------------
# Pure-JAX reference (correctness check only)
# --------------------------------------------------------------------------
def reference_forward(m, Q, K, V):
    def lin(x, w, b):
        return x @ w + b[0]

    def split(x):
        B, S, _ = x.shape
        return x.reshape(B, S, m.n_heads, m.d_k).transpose(0, 2, 1, 3)

    q = split(lin(Q, m.w_q, m.b_q))
    k = split(lin(K, m.w_k, m.b_k))
    v = split(lin(V, m.w_v, m.b_v))
    s = jnp.einsum("bhqd,bhkd->bhqk", q, k) / math.sqrt(m.d_k)
    p = jax.nn.softmax(s, axis=-1)
    a = jnp.einsum("bhqk,bhkd->bhqd", p, v)
    B, H, S, Dk = a.shape
    a = a.transpose(0, 2, 1, 3).reshape(B, S, m.d_model)
    return lin(a, m.w_o, m.b_o)


if __name__ == "__main__":
    # ---- Test 1: self-attention (fused QKV slab path), small module shapes ---
    B, S, d_model, n_heads = 2, 8, 32, 4
    k_params, k_x = jax.random.split(jax.random.PRNGKey(0))
    mha = MultiHeadAttentionPallas(d_model, n_heads, k_params)
    X = jax.random.normal(k_x, (B, S, d_model), jnp.float32)

    out = mha(X, X, X)
    jax.block_until_ready(out)
    ref = reference_forward(mha, X, X, X)
    assert out.shape == (B, S, d_model)
    assert jnp.allclose(out, ref, atol=2e-3, rtol=2e-3), "test1 mismatch vs reference"

    # ---- Test 2: cross-attention; forces multi-step K-reduction in the linear
    # kernel and a multi-KV-tile online-softmax loop in the flash kernel. ------
    B2, Sq2, Sk2, d_model2, n_heads2 = 2, 16, 32, 256, 4
    k_params2, k_q2, k_kv2 = jax.random.split(jax.random.PRNGKey(1), 3)
    mha2 = MultiHeadAttentionPallas(d_model2, n_heads2, k_params2,
                                    lin_tiles=(8, 128, 128), attn_tiles=(8, 8))
    Q2 = jax.random.normal(k_q2, (B2, Sq2, d_model2), jnp.float32)
    KV2 = jax.random.normal(k_kv2, (B2, Sk2, d_model2), jnp.float32)

    out2 = mha2(Q2, KV2, KV2)
    jax.block_until_ready(out2)
    ref2 = reference_forward(mha2, Q2, KV2, KV2)
    assert out2.shape == (B2, Sq2, d_model2)
    assert jnp.allclose(out2, ref2, atol=2e-3, rtol=2e-3), "test2 mismatch vs reference"

    print("KERNEL_OK")
</pallas_src>

<mosaic_0001>
module attributes {stable_mosaic.version = 11 : i64} {
  func.func @_linear_kernel(%arg0: i32, %arg1: i32, %arg2: i32, %arg3: memref<16x32xf32, #tpu.memory_space<vmem>>, %arg4: memref<32x96xf32, #tpu.memory_space<vmem>>, %arg5: memref<1x96xf32, #tpu.memory_space<vmem>>, %arg6: memref<16x96xf32, #tpu.memory_space<vmem>>, %arg7: memref<16x96xf32, #tpu.memory_space<vmem>>) attributes {dimension_semantics = [#tpu.dimension_semantics<parallel>, #tpu.dimension_semantics<parallel>, #tpu.dimension_semantics<arbitrary>], iteration_bounds = array<i64: 1, 1, 1>, scalar_prefetch = 0 : i64, scratch_operands = 1 : i64, tpu.core_type = #tpu.core_type<tc>, window_params = [{transform_indices = @transform_0, window_bounds = array<i64: 16, 32>}, {transform_indices = @transform_1, window_bounds = array<i64: 32, 96>}, {transform_indices = @transform_2, window_bounds = array<i64: 1, 96>}, {transform_indices = @transform_3, window_bounds = array<i64: 16, 96>}]} {
    %c0_i32 = arith.constant 0 : i32
    %0 = arith.cmpi eq, %arg2, %c0_i32 : i32
    %1 = arith.extui %0 : i1 to i32
    %c0_i32_0 = arith.constant 0 : i32
    %2 = arith.cmpi ne, %1, %c0_i32_0 : i32
    scf.if %2 {
      %cst_10 = arith.constant 0.000000e+00 : f32
      %12 = vector.broadcast %cst_10 : f32 to vector<16x96xf32>
      %c0_11 = arith.constant 0 : index
      %c0_12 = arith.constant 0 : index
      %13 = vector.load %arg7[%c0_11, %c0_12] : memref<16x96xf32, #tpu.memory_space<vmem>>, vector<16x96xf32>
      tpu.vector_store %arg7[%c0_11, %c0_12], %12 {strides = array<i32>} : memref<16x96xf32, #tpu.memory_space<vmem>>, vector<16x96xf32>,
    } else {
    }
    %c0 = arith.constant 0 : index
    %c0_1 = arith.constant 0 : index
    %3 = vector.load %arg7[%c0, %c0_1] : memref<16x96xf32, #tpu.memory_space<vmem>>, vector<16x96xf32>
    %c0_2 = arith.constant 0 : index
    %c0_3 = arith.constant 0 : index
    %4 = vector.load %arg3[%c0_2, %c0_3] : memref<16x32xf32, #tpu.memory_space<vmem>>, vector<16x32xf32>
    %c0_4 = arith.constant 0 : index
    %c0_5 = arith.constant 0 : index
    %5 = vector.load %arg4[%c0_4, %c0_5] : memref<32x96xf32, #tpu.memory_space<vmem>>, vector<32x96xf32>
    %cst = arith.constant dense<0.000000e+00> : vector<16x96xf32>
    %6 = tpu.matmul %4, %5, %cst {dimension_numbers = #tpu.dot_dimension_numbers<[1], [0], [0], [1], [0, 0, 1, 1], [], []>} : vector<16x32xf32>, vector<32x96xf32>, vector<16x96xf32> -> vector<16x96xf32>
    %7 = arith.addf %3, %6 : vector<16x96xf32>
    %c0_6 = arith.constant 0 : index
    %c0_7 = arith.constant 0 : index
    %8 = vector.load %arg7[%c0_6, %c0_7] : memref<16x96xf32, #tpu.memory_space<vmem>>, vector<16x96xf32>
    tpu.vector_store %arg7[%c0_6, %c0_7], %7 {strides = array<i32>} : memref<16x96xf32, #tpu.memory_space<vmem>>, vector<16x96xf32>,
    %c0_i32_8 = arith.constant 0 : i32
    %9 = arith.cmpi eq, %arg2, %c0_i32_8 : i32
    %10 = arith.extui %9 : i1 to i32
    %c0_i32_9 = arith.constant 0 : i32
    %11 = arith.cmpi ne, %10, %c0_i32_9 : i32
    scf.if %11 {
      %c0_10 = arith.constant 0 : index
      %c0_11 = arith.constant 0 : index
      %12 = vector.load %arg7[%c0_10, %c0_11] : memref<16x96xf32, #tpu.memory_space<vmem>>, vector<16x96xf32>
      %c0_12 = arith.constant 0 : index
      %c0_13 = arith.constant 0 : index
      %13 = vector.load %arg5[%c0_12, %c0_13] : memref<1x96xf32, #tpu.memory_space<vmem>>, vector<1x96xf32>
      %14 = vector.broadcast %13 : vector<1x96xf32> to vector<16x96xf32>
      %15 = arith.addf %12, %14 : vector<16x96xf32>
      %c0_14 = arith.constant 0 : index
      %c0_15 = arith.constant 0 : index
      %16 = vector.load %arg6[%c0_14, %c0_15] : memref<16x96xf32, #tpu.memory_space<vmem>>, vector<16x96xf32>
      tpu.vector_store %arg6[%c0_14, %c0_15], %15 {strides = array<i32>} : memref<16x96xf32, #tpu.memory_space<vmem>>, vector<16x96xf32>,
    } else {
    }
    return
  }
  func.func @transform_0(%arg0: i32, %arg1: i32, %arg2: i32) -> (i32, i32) {
    %c0_i32 = arith.constant 0 : i32
    return %arg0, %arg2 : i32, i32
  }
  func.func @transform_1(%arg0: i32, %arg1: i32, %arg2: i32) -> (i32, i32) {
    %c0_i32 = arith.constant 0 : i32
    return %arg2, %arg1 : i32, i32
  }
  func.func @transform_2(%arg0: i32, %arg1: i32, %arg2: i32) -> (i32, i32) {
    %c0_i32 = arith.constant 0 : i32
    %c0_i32_0 = arith.constant 0 : i32
    return %c0_i32, %arg1 : i32, i32
  }
  func.func @transform_3(%arg0: i32, %arg1: i32, %arg2: i32) -> (i32, i32) {
    %c0_i32 = arith.constant 0 : i32
    return %arg0, %arg1 : i32, i32
  }
}

</mosaic_0001>

<bundles_post_ra>
// kernel: tpu_custom_call.1
= control target key start
LH: loop header
LB: loop body
LE: loop exit
PB: predicated region body
PF: predicated region fallthrough
CT: control target
= control target key end

     0   :  { %8 = vsyncpa [#allocation4], 0  ;;  %s274_s0 = inlined_call_operand.hbm [shape: f32[16,32], index: 0, kind: input, shape index: {}]   ;;  %s275_s1 = inlined_call_operand.hbm [shape: f32[32,96], index: 1, kind: input, shape index: {}]   ;;  %s276_s2 = inlined_call_operand.vmem [shape: f32[1,96], index: 2, kind: input, shape index: {}]   ;;  %s277_s3 = inlined_call_operand.hbm [shape: f32[16,96], index: 3, kind: output, shape index: {}]  }
   0x1   :  { %9 = vsyncpa [#allocation7], 0 }
   0x2   :  { %10 = vsyncpa [#allocation5], 0  ;;  %s15_s14 = sshll.u32 %s274_s0, 4  ;;  %s221_s15 = smov [#allocation3]   ;;  %s16_s14 = int_to_ptr.hbm [resolvable:$true] %s15_s14 }
   0x3   :  { %s17_s16 = sshll.u32 %s221_s15, 4  ;;  %s28_s19 = sshll.u32 %s275_s1, 4  ;;  %s18_s16 = int_to_ptr.vmem [resolvable:$true] %s17_s16  ;;  %s29_s19 = int_to_ptr.hbm [resolvable:$true] %s28_s19 }
   0x4   :  { %s222_s20 = smov 128   ;;  %s223_s21 = smov 8  }
   0x5   :  { %23 = dma.hbm_to_vmem [thread:$0]  %s16_s14, 256, %s18_s16, [#allocation4], %s222_s20, %s222_s20, %s223_s21  }
   0x6   :  { %s224_s22 = smov [#allocation6]  }
   0x7   :  { %s30_s23 = sshll.u32 %s224_s22, 4  ;;  %s31_s23 = int_to_ptr.vmem [resolvable:$true] %s30_s23 }
   0x8   :  { %36 = dma.hbm_to_vmem [thread:$0]  %s29_s19, 512, %s31_s23, [#allocation7], %s222_s20, %s222_s20, %s223_s21  }
   0x9   :  { %215 = dma.done.wait [#allocation4], 256  }
   0xa   :  { %216 = vsyncadd [#allocation4], 4294967040 }
   0xb   :  { %217 = dma.done.wait [#allocation7], 512  }
   0xc   :  { %218 = vsyncadd [#allocation7], 4294966784  ;;  %vm51_vm0 = vcmask 785408   ;;  %v225_v0 = vmov 0.0   ;;  %v61_v1 = vld [vmem:[#allocation6 + $0x18] sm:$0xff]  ;;  %v60_v2 = vld [vmem:[#allocation6 + $0x10] sm:$0xff] }
   0xd   :  { %52 = vst.msk [vmem:[#allocation2] sm:$0xff] %vm51_vm0, %v225_v0  ;;  %81 = vmatpush.msra.mxu0 %v61_v1  ;;  %132 = vmatpush.msra.mxu1 %v61_v1  ;;  %v59_v3 = vld [vmem:[#allocation6 + $0x8] sm:$0xff]  ;;  %v58_v4 = vld [vmem:[#allocation6] sm:$0xff]  ;;  %v56_v5 = vld [vmem:[#allocation3] sm:$0xff]  ;;  %vm62_vm1 = vcmask 261120   ;;  %s226_s24 = smov [#allocation8]  }
   0xe   :  { %53 = vst.msk [vmem:[#allocation2 + $0x8] sm:$0xff] %vm51_vm0, %v225_v0  ;;  %v57_v6 = vld [vmem:[#allocation3 + $0x8] sm:$0xff]  ;;  %v142_v13 = vld [vmem:[%s276_s2] ss:$0 sm:$0xff]  ;;  %s114_s25 = sshll.u32 %s226_s24, 4  ;;  %s116_s28 = sshll.u32 %s277_s3, 4  ;;  %s115_s25 = int_to_ptr.vmem [resolvable:$true] %s114_s25  ;;  %s117_s28 = int_to_ptr.hbm [resolvable:$true] %s116_s28 }
   0xf   :  { %82 = vmatpush.msra.mxu0 %v60_v2  ;;  %133 = vmatpush.msra.mxu1 %v60_v2 }
  0x11   :  { %83 = vmatpush.msra.mxu0 %v59_v3  ;;  %134 = vmatpush.msra.mxu1 %v59_v3 }
  0x13   :  { %84 = vmatpush.msra.mxu0 %v58_v4  ;;  %135 = vmatpush.msra.mxu1 %v58_v4 }
  0x14   :  { %130 = vmatmul.msk.f32.vlgmr.msra.gmra.mxu0 %vm62_vm1, %v56_v5  ;;  %131 = vmatmul.msk.f32.vlgmr.msra.gmra.mxu1 %vm62_vm1, %v57_v6  ;;  %v54_v7 = vld [vmem:[#allocation2] sm:$0xff] }
  0x15   :  { %v55_v8 = vld [vmem:[#allocation2 + $0x8] sm:$0xff] }
  0x91   :  { %v86_v9 = vpop.f32.mrf.mxu0  ;;  %v89_v10 = vpop.f32.mrf.mxu1 }
  0x92   :  { %v92_v11 = vadd.f32 %v86_v9, %v54_v7  ;;  %v93_v12 = vadd.f32 %v89_v10, %v55_v8 }
  0x94   :  { %95 = vst.msk [vmem:[#allocation2] sm:$0xff] %vm51_vm0, %v92_v11 }
  0x95   :  { %96 = vst.msk [vmem:[#allocation2 + $0x8] sm:$0xff] %vm51_vm0, %v93_v12 }
  0x9b   :  { %v100_v14 = vld [vmem:[#allocation2] sm:$0xff] }
  0x9c   :  { %v101_v15 = vld [vmem:[#allocation2 + $0x8] sm:$0xff]  ;;  %v106_v16 = vadd.f32 %v142_v13, %v100_v14 }
  0x9d   :  { %v107_v17 = vadd.f32 %v142_v13, %v101_v15 }
  0x9e   :  { %108 = vst.msk [vmem:[#allocation8] sm:$0xff] %vm51_vm0, %v106_v16 }
  0x9f   :  { %109 = vst.msk [vmem:[#allocation8 + $0x8] sm:$0xff] %vm51_vm0, %v107_v17 }
  0xa0   :  { %122 = dma.vmem_to_hbm [thread:$0]  %s115_s25, 256, %s117_s28, [#allocation5], %s222_s20, %s222_s20, %s223_s21  }
  0xa1   :  { %219 = dma.done.wait [#allocation5], 256  }
  0xa2   :  { %220 = vsyncadd [#allocation5], 4294967040 }
  0xa3   :  { %127 = vsyncpa [#allocation4], 1 }
  0xa4   :  { %128 = vsyncpa [#allocation7], 1 }
  0xa5   :  { %129 = vsyncpa [#allocation5], 1 }

</bundles_post_ra>
